<compile_context>
chip_gen: v6e
topology: v6e:2x2x1
jax: 0.10.0
libtpu: 0.0.40
codegen_flags: <defaults>
</compile_context>

<pallas_src>
import math

import jax
import jax.numpy as jnp
from jax.experimental import pallas as pl
from jax.experimental.pallas import tpu as pltpu


def _fourier_kernel(x_ref, w_ref, p_ref, o_ref):
    """x_ref: (TB, C) f32, w_ref/p_ref: (1, 2F) f32, o_ref: (TB, C*2F) f32."""
    _tb, c = x_ref.shape
    x = x_ref[...]
    w = w_ref[...]          # [2*pi*f_0 .. 2*pi*f_{F-1}, 2*pi*f_0 .. 2*pi*f_{F-1}]
    p = p_ref[...]          # [0 .. 0, -pi/2 .. -pi/2]   (cos(t - pi/2) == sin(t))
    # Per input channel: broadcast the scalar across the 2F lanes of its output group.
    # C is small for this module, so the Python loop is a tiny static unroll; the pieces
    # are assembled in-register into one lane-dense row, then a single full-width store.
    pieces = [x[:, ci:ci + 1] * w + p for ci in range(c)]     # each (TB, 2F)
    o_ref[...] = jnp.cos(jnp.concatenate(pieces, axis=-1))    # (TB, C*2F)


def fourier_embedding(x, freqs, *, block_rows=4096):
    """x: (B, C), freqs: (F,)  ->  (B, C * 2F) float32 (matches the PyTorch module)."""
    b, c = x.shape
    (f,) = freqs.shape
    two_f = 2 * f
    out_w = c * two_f

    xf = x.astype(jnp.float32)
    # Fold 2*pi into the frequency operand once; lay out one 2F-wide [cos | sin] group.
    w_half = (2.0 * math.pi) * freqs.astype(jnp.float32)                  # (F,)
    w_row = jnp.concatenate([w_half, w_half]).reshape(1, two_f)           # (1, 2F)
    p_row = jnp.concatenate(
        [jnp.zeros((f,), jnp.float32),
         jnp.full((f,), -0.5 * math.pi, jnp.float32)]).reshape(1, two_f)  # (1, 2F)

    # Row tile: whole batch if small (block == full dim satisfies the (8,128) rule),
    # otherwise a multiple-of-8 tile.  Ragged tails are handled by Pallas boundary
    # padding, so no input pad / output slice copies are needed.
    tb = b if b <= block_rows else max(8, (block_rows // 8) * 8)
    grid = (pl.cdiv(b, tb),)

    return pl.pallas_call(
        _fourier_kernel,
        out_shape=jax.ShapeDtypeStruct((b, out_w), jnp.float32),
        grid=grid,
        in_specs=[
            pl.BlockSpec((tb, c), lambda i: (i, 0)),
            pl.BlockSpec((1, two_f), lambda i: (0, 0)),
            pl.BlockSpec((1, two_f), lambda i: (0, 0)),
        ],
        out_specs=pl.BlockSpec((tb, out_w), lambda i: (i, 0)),
        compiler_params=pltpu.CompilerParams(
            dimension_semantics=("parallel",)),   # megacore sharding on v7x; neutral elsewhere
    )(xf, w_row, p_row)


def fourier_embedding_ref(x, freqs):
    """Pure-jnp reference mirroring the PyTorch module."""
    b, c = x.shape
    xf = x.astype(jnp.float32).reshape(-1, 1)                             # (b*c, 1)
    prod = xf * ((2.0 * math.pi) * freqs.astype(jnp.float32))[None, :]    # (b*c, F)
    out = jnp.concatenate([jnp.cos(prod), jnp.sin(prod)], axis=1)         # (b*c, 2F)
    return out.reshape(b, -1)


if __name__ == "__main__":
    num_channels = 32     # embedding channels per input scalar
    scale = 16.0
    b, c = 2, 4

    key = jax.random.PRNGKey(0)
    kx, kf, kx2 = jax.random.split(key, 3)
    x = jax.random.normal(kx, (b, c), dtype=jnp.float32)
    # deterministic synthetic buffer: freqs = randn(num_channels // 2) * scale
    freqs = jax.random.normal(kf, (num_channels // 2,), dtype=jnp.float32) * scale

    out = jax.block_until_ready(fourier_embedding(x, freqs))
    ref = fourier_embedding_ref(x, freqs)
    assert out.shape == (b, c * num_channels), out.shape
    # |2*pi*x*f| reaches O(10^2); f32 cos/sin there legitimately differ by a few 1e-5
    # between formulations (sin(t) vs cos(t - pi/2)) and implementations, so compare with
    # an absolute tolerance far below the O(1) output scale but above transcendental noise.
    assert jnp.allclose(out, ref, atol=5e-3, rtol=0.0), "mismatch vs reference (small case)"

    # Larger case exercising the tiled multi-block pipeline with a ragged tail
    # (300 rows, 64-row tiles -> 5 blocks, last block padded by Pallas, no host-side pad).
    b2 = 300
    x2 = jax.random.normal(kx2, (b2, c), dtype=jnp.float32)
    out2 = jax.block_until_ready(fourier_embedding(x2, freqs, block_rows=64))
    ref2 = fourier_embedding_ref(x2, freqs)
    assert out2.shape == (b2, c * num_channels), out2.shape
    assert jnp.allclose(out2, ref2, atol=5e-3, rtol=0.0), "mismatch vs reference (tiled case)"

    print("KERNEL_OK")
</pallas_src>

<mosaic_0001>
module attributes {stable_mosaic.version = 11 : i64} {
  func.func @_fourier_kernel(%arg0: i32, %arg1: memref<2x4xf32, #tpu.memory_space<vmem>>, %arg2: memref<1x32xf32, #tpu.memory_space<vmem>>, %arg3: memref<1x32xf32, #tpu.memory_space<vmem>>, %arg4: memref<2x128xf32, #tpu.memory_space<vmem>>) attributes {dimension_semantics = [#tpu.dimension_semantics<parallel>], iteration_bounds = array<i64: 1>, scalar_prefetch = 0 : i64, scratch_operands = 0 : i64, tpu.core_type = #tpu.core_type<tc>, window_params = [{transform_indices = @transform_0, window_bounds = array<i64: 2, 4>}, {pipeline_mode = #tpu.pipeline_mode<synchronous>, transform_indices = @transform_1, window_bounds = array<i64: 1, 32>}, {pipeline_mode = #tpu.pipeline_mode<synchronous>, transform_indices = @transform_2, window_bounds = array<i64: 1, 32>}, {transform_indices = @transform_3, window_bounds = array<i64: 2, 128>}]} {
    %c0 = arith.constant 0 : index
    %c0_0 = arith.constant 0 : index
    %0 = vector.load %arg1[%c0, %c0_0] : memref<2x4xf32, #tpu.memory_space<vmem>>, vector<2x4xf32>
    %c0_1 = arith.constant 0 : index
    %c0_2 = arith.constant 0 : index
    %1 = vector.load %arg2[%c0_1, %c0_2] : memref<1x32xf32, #tpu.memory_space<vmem>>, vector<1x32xf32>
    %c0_3 = arith.constant 0 : index
    %c0_4 = arith.constant 0 : index
    %2 = vector.load %arg3[%c0_3, %c0_4] : memref<1x32xf32, #tpu.memory_space<vmem>>, vector<1x32xf32>
    %3 = vector.extract_strided_slice %0 {offsets = [0, 0], sizes = [2, 1], strides = [1, 1]} : vector<2x4xf32> to vector<2x1xf32>
    %4 = vector.broadcast %3 : vector<2x1xf32> to vector<2x32xf32>
    %5 = vector.broadcast %1 : vector<1x32xf32> to vector<2x32xf32>
    %6 = arith.mulf %4, %5 : vector<2x32xf32>
    %7 = vector.broadcast %2 : vector<1x32xf32> to vector<2x32xf32>
    %8 = arith.addf %6, %7 : vector<2x32xf32>
    %9 = vector.extract_strided_slice %0 {offsets = [0, 1], sizes = [2, 1], strides = [1, 1]} : vector<2x4xf32> to vector<2x1xf32>
    %10 = vector.broadcast %9 : vector<2x1xf32> to vector<2x32xf32>
    %11 = vector.broadcast %1 : vector<1x32xf32> to vector<2x32xf32>
    %12 = arith.mulf %10, %11 : vector<2x32xf32>
    %13 = vector.broadcast %2 : vector<1x32xf32> to vector<2x32xf32>
    %14 = arith.addf %12, %13 : vector<2x32xf32>
    %15 = vector.extract_strided_slice %0 {offsets = [0, 2], sizes = [2, 1], strides = [1, 1]} : vector<2x4xf32> to vector<2x1xf32>
    %16 = vector.broadcast %15 : vector<2x1xf32> to vector<2x32xf32>
    %17 = vector.broadcast %1 : vector<1x32xf32> to vector<2x32xf32>
    %18 = arith.mulf %16, %17 : vector<2x32xf32>
    %19 = vector.broadcast %2 : vector<1x32xf32> to vector<2x32xf32>
    %20 = arith.addf %18, %19 : vector<2x32xf32>
    %21 = vector.extract_strided_slice %0 {offsets = [0, 3], sizes = [2, 1], strides = [1, 1]} : vector<2x4xf32> to vector<2x1xf32>
    %22 = vector.broadcast %21 : vector<2x1xf32> to vector<2x32xf32>
    %23 = vector.broadcast %1 : vector<1x32xf32> to vector<2x32xf32>
    %24 = arith.mulf %22, %23 : vector<2x32xf32>
    %25 = vector.broadcast %2 : vector<1x32xf32> to vector<2x32xf32>
    %26 = arith.addf %24, %25 : vector<2x32xf32>
    %27 = tpu.concatenate %8, %14, %20, %26 in 1 : vector<2x32xf32>, vector<2x32xf32>, vector<2x32xf32>, vector<2x32xf32> -> vector<2x128xf32>
    %28 = math.cos %27 : vector<2x128xf32>
    %c0_5 = arith.constant 0 : index
    %c0_6 = arith.constant 0 : index
    %29 = vector.load %arg4[%c0_5, %c0_6] : memref<2x128xf32, #tpu.memory_space<vmem>>, vector<2x128xf32>
    tpu.vector_store %arg4[%c0_5, %c0_6], %28 {strides = array<i32>} : memref<2x128xf32, #tpu.memory_space<vmem>>, vector<2x128xf32>,
    return
  }
  func.func @transform_0(%arg0: i32) -> (i32, i32) {
    %c0_i32 = arith.constant 0 : i32
    %c0_i32_0 = arith.constant 0 : i32
    return %arg0, %c0_i32 : i32, i32
  }
  func.func @transform_1(%arg0: i32) -> (i32, i32) {
    %c0_i32 = arith.constant 0 : i32
    %c0_i32_0 = arith.constant 0 : i32
    %c0_i32_1 = arith.constant 0 : i32
    return %c0_i32, %c0_i32_0 : i32, i32
  }
  func.func @transform_2(%arg0: i32) -> (i32, i32) {
    %c0_i32 = arith.constant 0 : i32
    %c0_i32_0 = arith.constant 0 : i32
    %c0_i32_1 = arith.constant 0 : i32
    return %c0_i32, %c0_i32_0 : i32, i32
  }
  func.func @transform_3(%arg0: i32) -> (i32, i32) {
    %c0_i32 = arith.constant 0 : i32
    %c0_i32_0 = arith.constant 0 : i32
    return %arg0, %c0_i32 : i32, i32
  }
}

</mosaic_0001>

<bundles_post_ra>
// kernel: tpu_custom_call.1
= control target key start
LH: loop header
LB: loop body
LE: loop exit
PB: predicated region body
PF: predicated region fallthrough
CT: control target
= control target key end

     0   :  { %8 = vsyncpa [#allocation3], 0  ;;  %s350_s0 = inlined_call_operand.hbm [shape: f32[2,4], index: 0, kind: input, shape index: {}]   ;;  %s351_s1 = inlined_call_operand.vmem [shape: f32[1,32], index: 1, kind: input, shape index: {}]   ;;  %s352_s2 = inlined_call_operand.vmem [shape: f32[1,32], index: 2, kind: input, shape index: {}]   ;;  %s353_s3 = inlined_call_operand.hbm [shape: f32[2,128], index: 3, kind: output, shape index: {}]  }
   0x1   :  { %9 = vsyncpa [#allocation4], 0  ;;  %s282_s12 = smov [#allocation2]  }
   0x2   :  { %s16_s13 = sshll.u32 %s282_s12, 4  ;;  %s17_s13 = int_to_ptr.vmem [resolvable:$true] %s16_s13 }
   0x3   :  { %s246_s14 = scalar_lea.vmem %s17_s13, 32  ;;  %p251_p1 = scmp.lt.s32.totalorder %s17_s13, %s17_s13 }
   0x4   :  { %p247_p0 = scmp.ne.s32.totalorder %s17_s13, %s246_s14  ;;  %p252_p2 = scmp.lt.s32.totalorder %s246_s14, %s246_s14 }
   0x6   :  { %p253_p3 = por %p252_p2, %p251_p1 }
   0x8   :  { %p254_p4 = pnand %p253_p3, %p247_p0 }
   0xa   :  { %257 = shalt.err (!%p254_p4)
}
   0xb   :  { %19 = dma.hbm_to_vmem [thread:$0]  %s350_s0, 32, %s17_s13, [#allocation3]  }
   0xc   :  { %278 = dma.done.wait [#allocation3], 32  }
   0xd   :  { %279 = vsyncadd [#allocation3], 4294967264  ;;  %v283_v0 = vmov 1   ;;  %v284_v1 = vmov 3   ;;  %v27_v2 = vld [vmem:[#allocation2] sm:$0x3] }
   0xe   :  { %229 = vset.pattern.permute.xlu0 %v283_v0  ;;  %231 = vset.pattern.permute.xlu1 %v284_v1  ;;  %v285_v3 = vmov 2   ;;  %v286_v4 = vmov 0   ;;  %v204_v5 = vld [vmem:[%s351_s1] ss:$0 sm:$0xff]  ;;  %s287_s20 = smov 32   ;;  %s288_s21 = smov 96  }
   0xf   :  { %50 = vperm.xlu0 %229, %v27_v2   ;;  %62 = vperm.xlu1 %231, %v27_v2   ;;  %v205_v6 = vld [vmem:[%s352_s2] ss:$0 sm:$0xff]  ;;  %s289_s1 = smov 64   ;;  %vm79_vm0 = vcmask 261120   ;;  %vm81_vm1 = vcmask 523264   ;;  %vm83_vm2 = vcmask 785408  }
  0x10   :  { %v290_v35 = vmov 683565275   ;;  %v291_v37 = vmov 2475754826   ;;  %v292_v40 = vmov 2131351028  }
  0x11   :  { %v293_v43 = vmov 2102212464   ;;  %v294_v46 = vmov 920167782   ;;  %v295_v49 = vmov 1326507024  }
  0x12   :  { %s296_s2 = smov [#allocation5]  }
  0x13   :  { %230 = vset.pattern.permute.xlu0 %v285_v3  ;;  %232 = vset.pattern.permute.xlu1 %v286_v4  ;;  %s195_s22 = sshll.u32 %s296_s2, 4  ;;  %s196_s22 = int_to_ptr.vmem [resolvable:$true] %s195_s22 }
  0x14   :  { %56 = vperm.xlu0 %230, %v27_v2   ;;  %32 = vperm.xlu1 %232, %v27_v2   ;;  %s258_s23 = scalar_lea.vmem %s196_s22, 32  ;;  %p263_p6 = scmp.lt.s32.totalorder %s196_s22, %s196_s22 }
  0x15   :  { %p259_p5 = scmp.ne.s32.totalorder %s196_s22, %s258_s23  ;;  %p264_p7 = scmp.lt.s32.totalorder %s258_s23, %s258_s23 }
  0x17   :  { %p265_p8 = por %p264_p7, %p263_p6 }
  0x18   :  { %233 = vset.pattern.permute.xlu0 %v284_v1 }
  0x19   :  { %p266_p9 = pnand %p265_p8, %p259_p5 }
  0x8a   :  { %v51_v7 = vpop.permute.xlu0 %50  ;;  %v63_v8 = vpop.permute.xlu1 %62 }
  0x8b   :  { %v53_v9 = vmul.f32 %v204_v5, %v51_v7  ;;  %v65_v10 = vmul.f32 %v204_v5, %v63_v8 }
  0x8d   :  { %v54_v11 = vadd.f32 %v205_v6, %v53_v9  ;;  %v66_v13 = vadd.f32 %v205_v6, %v65_v10 }
  0x8f   :  { %68 = vrot.lane.b32.xlu1 %v54_v11, %s287_s20  ;;  %v57_v12 = vpop.permute.xlu0 %56  ;;  %v33_v14 = vpop.permute.xlu1 %32 }
  0x90   :  { %v59_v15 = vmul.f32 %v204_v5, %v57_v12  ;;  %v41_v16 = vmul.f32 %v204_v5, %v33_v14 }
  0x92   :  { %v60_v17 = vadd.f32 %v205_v6, %v59_v15  ;;  %v48_v18 = vadd.f32 %v205_v6, %v41_v16 }
  0x93   :  { %76 = vrot.lane.b32.xlu1 %v66_v13, %s288_s21 }
  0x94   :  { %72 = vrot.lane.b32.xlu0 %v60_v17, %s289_s1 }
 0x101   :  { %v69_v19 = vpop.permute.xlu1 %68 }
 0x102   :  { %v80_v21 = vsel %vm79_vm0, %v48_v18, %v69_v19 }
 0x105   :  { %v77_v20 = vpop.permute.xlu1 %76 }
 0x106   :  { %v73_v22 = vpop.permute.xlu0 %72 }
 0x107   :  { %v82_v23 = vsel %vm81_vm1, %v80_v21, %v73_v22 }
 0x108   :  { %v326_v24 = vsel %vm83_vm2, %v82_v23, %v77_v20 }
 0x109   :  { %v88_v25 = vand.u32 2139095040, %v326_v24  ;;  %v85_v29 = vand.u32 2147483647, %v326_v24  ;;  %vm87_vm10 = vcmp.lt.s32.totalorder %v326_v24, 0  ;;  %vm177_vm15 = vweird.f32 %v326_v24 }
 0x10b   :  { %v89_v26 = vshrl.u32 %v88_v25, 23  ;;  %v92_v32 = vand.u32 8388607, %v85_v29  ;;  %vm86_vm11 = vcmp.le.f32.partialorder %v85_v29, 0.7853982 }
 0x10d   :  { %v206_v27 = vadd.s32 4294967169, %v89_v26  ;;  %v93_v51 = vor.u32 8388608, %v92_v32 }
 0x10f   :  { %v95_v28 = vadd.s32 1, %v206_v27  ;;  %v133_v1 = vshll.u32 %v93_v51, 8 }
 0x111   :  { %vm96_vm3 = vcmp.gt.s32.totalorder %v95_v28, 0 }
 0x112   :  { %v97_v30 = vsel %vm96_vm3, %v95_v28, 0 }
 0x113   :  { %v99_v31 = vand.u32 31, %v97_v30  ;;  %v98_v34 = vshrl.u32 %v97_v30, 5 }
 0x115   :  { %v100_v33 = vsub.s32 32, %v99_v31  ;;  %v102_v36 = vshll.u32 %v290_v35, %v99_v31  ;;  %v105_v38 = vshll.u32 %v291_v37, %v99_v31  ;;  %v108_v42 = vshll.u32 %v292_v40, %v99_v31 }
 0x116   :  { %v111_v45 = vshll.u32 %v293_v43, %v99_v31  ;;  %v114_v48 = vshll.u32 %v294_v46, %v99_v31  ;;  %vm117_vm4 = vcmp.lt.s32.totalorder %v98_v34, 1  ;;  %vm120_vm5 = vcmp.lt.s32.totalorder %v98_v34, 4 }
 0x117   :  { %v103_v39 = vshrl.u32 %v291_v37, %v100_v33  ;;  %v106_v41 = vshrl.u32 %v292_v40, %v100_v33  ;;  %v109_v44 = vshrl.u32 %v293_v43, %v100_v33  ;;  %v112_v47 = vshrl.u32 %v294_v46, %v100_v33 }
 0x118   :  { %v115_v50 = vshrl.u32 %v295_v49, %v100_v33  ;;  %v101_v60 = vshrl.u32 %v290_v35, %v100_v33  ;;  %vm119_vm6 = vcmp.lt.s32.totalorder %v98_v34, 3  ;;  %vm118_vm7 = vcmp.lt.s32.totalorder %v98_v34, 2 }
 0x119   :  { %v104_v52 = vor.u32 %v103_v39, %v102_v36  ;;  %v107_v53 = vor.u32 %v106_v41, %v105_v38  ;;  %v110_v54 = vor.u32 %v109_v44, %v108_v42  ;;  %v113_v55 = vor.u32 %v112_v47, %v111_v45 }
 0x11a   :  { %v116_v56 = vor.u32 %v115_v50, %v114_v48 }
 0x11b   :  { %v122_v57 = vsel %vm120_vm5, %v110_v54, 2102212464  ;;  %v125_v58 = vsel %vm117_vm4, %v104_v52, %v107_v53  ;;  %v129_v59 = vsel %vm117_vm4, %v107_v53, %v110_v54  ;;  %v126_v61 = vsel %vm120_vm5, %v113_v55, 920167782 }
 0x11c   :  { %v130_v62 = vsel %vm120_vm5, %v116_v56, 1326507024  ;;  %v127_v63 = vsel %vm119_vm6, %v110_v54, %v126_v61  ;;  %v121_v2 = vsel %vm117_vm4, %v101_v60, %v104_v52  ;;  %v123_v3 = vsel %vm119_vm6, %v107_v53, %v122_v57 }
 0x11d   :  { %v131_v0 = vsel %vm119_vm6, %v113_v55, %v130_v62  ;;  %v128_v4 = vsel %vm118_vm7, %v125_v58, %v127_v63  ;;  %v124_v10 = vsel %vm118_vm7, %v121_v2, %v123_v3 }
 0x11e   :  { %v132_v5 = vsel %vm118_vm7, %v129_v59, %v131_v0  ;;  %v335_v8 = vmul.u32.u64.low %v133_v1, %v128_v4  ;;  %v336_v9 = vmul.u32.u64.high %v133_v1, %v128_v4, %v335_v8  ;;  %v140_v12 = vmul.u32 %v133_v1, %v124_v10 }
 0x11f   :  { %v332_v6 = vmul.u32.u64.low %v133_v1, %v132_v5  ;;  %v333_v7 = vmul.u32.u64.high %v133_v1, %v132_v5, %v332_v6 }
 0x120   :  { %v143_v11 = vadd.s32 1, %v336_v9 }
 0x121   :  { %vm142_vm8 = vc.u32 %v333_v7, %v335_v8  ;;  %v141_v25 = vadd.s32 %v335_v8, %v333_v7 }
 0x122   :  { %v144_v13 = vsel %vm142_vm8, %v143_v11, %v336_v9 }
 0x123   :  { %v145_v14 = vadd.s32 %v144_v13, %v140_v12 }
 0x125   :  { %v146_v15 = vadd.s32 536870912, %v145_v14 }
 0x127   :  { %v147_v16 = vshrl.u32 %v146_v15, 30 }
 0x129   :  { %v148_v17 = vshll.u32 %v147_v16, 30  ;;  %v171_v41 = vsub.s32 4, %v147_v16 }
 0x12b   :  { %v149_v18 = vsub.s32 %v145_v14, %v148_v17  ;;  %v172_v42 = vsel %vm87_vm10, %v171_v41, %v147_v16 }
 0x12c   :  { %v174_v43 = vsel %vm86_vm11, 0, %v172_v42 }
 0x12d   :  { %v151_v19 = vsub.s32 0, %v149_v18  ;;  %v178_v44 = vand.u32 3, %v174_v43 }
 0x12f   :  { %v207_v20 = vmin.u32 %v151_v19, %v149_v18  ;;  %vm183_vm12 = vcmp.eq.s32.totalorder %v178_v44, 2  ;;  %vm180_vm13 = vcmp.eq.s32.totalorder %v178_v44, 0  ;;  %vm179_vm14 = vcmp.lt.s32.totalorder %v178_v44, 2 }
 0x131   :  { %v153_v21 = vclz %v207_v20 }
 0x133   :  { %v208_v22 = vadd.s32 4294967294, %v153_v21 }
 0x135   :  { %vm209_vm9 = vcmp.lt.s32.totalorder %v208_v22, 0 }
 0x136   :  { %v156_v23 = vsel %vm209_vm9, 0, %v208_v22 }
 0x137   :  { %v157_v26 = vsub.s32 32, %v156_v23  ;;  %v161_v27 = vsub.s32 4294967266, %v156_v23  ;;  %v158_v28 = vshll.u32 %v149_v18, %v156_v23 }
 0x139   :  { %v159_v30 = vshrl.u32 %v141_v25, %v157_v26  ;;  %v162_v31 = vadd.s32 127, %v161_v27 }
 0x13b   :  { %v160_v32 = vor.u32 %v159_v30, %v158_v28  ;;  %v163_v33 = vshll.u32 %v162_v31, 23 }
 0x13d   :  { %v164_v34 = vor.u32 4788187, %v163_v33  ;;  %v167_v36 = vcvt.s32.f32 %v160_v32 }
 0x13f   :  { %v165_v35 = vand.u32 2147483647, %v164_v34 }
 0x141   :  { %v168_v37 = vmul.f32 %v167_v36, %v165_v35 }
 0x143   :  { %v169_v38 = vxor.u32 2147483648, %v168_v37 }
 0x145   :  { %v170_v39 = vsel %vm87_vm10, %v169_v38, %v168_v37 }
 0x146   :  { %v173_v40 = vsel %vm86_vm11, %v326_v24, %v170_v39 }
 0x147   :  { %234 = vcosq.f32 %v173_v40 }
 0x148   :  { %236 = vsinq.f32 %v173_v40 }
 0x154   :  { %v235_v45 = vpop.eup %234 }
 0x155   :  { %v237_v46 = vpop.eup %236  ;;  %v184_v47 = vxor.u32 2147483648, %v235_v45 }
 0x156   :  { %v181_v48 = vxor.u32 2147483648, %v237_v46 }
 0x157   :  { %v185_v49 = vsel %vm183_vm12, %v184_v47, %v237_v46 }
 0x158   :  { %v182_v29 = vsel %vm180_vm13, %v235_v45, %v181_v48 }
 0x159   :  { %v186_v50 = vsel %vm179_vm14, %v182_v29, %v185_v49 }
 0x15a   :  { %v187_v51 = vsel %vm177_vm15, nan, %v186_v50 }
 0x15b   :  { %188 = vst [vmem:[#allocation5] sm:$0x3] %v187_v51 }
 0x15c   :  { %269 = shalt.err (!%p266_p9)
}
 0x15d   :  { %198 = dma.vmem_to_hbm [thread:$0]  %s196_s22, 32, %s353_s3, [#allocation4]  }
 0x15e   :  { %280 = dma.done.wait [#allocation4], 32  }
 0x15f   :  { %281 = vsyncadd [#allocation4], 4294967264 }
 0x160   :  { %202 = vsyncpa [#allocation3], 1 }
 0x161   :  { %203 = vsyncpa [#allocation4], 1 }

</bundles_post_ra>
